<compile_context>
chip_gen: v5e
topology: v5e:2x2
jax: 0.10.0
libtpu: 0.0.40
codegen_flags: <defaults>
</compile_context>

<pallas_src>
import functools

import jax
import jax.numpy as jnp
from jax import lax
from jax.experimental import pallas as pl
from jax.experimental.pallas import tpu as pltpu

_COLS = 128
_TARGET_BLOCK_BYTES = 4 * 1024 * 1024          # ~4 MiB HBM per input per buffer
_SUB_ROWS_CANDIDATES = (512, 256, 128, 64, 32, 16, 8)


def _sublane_multiple(dtype) -> int:
    """Sublane granularity for a dtype: f32 -> 8, bf16/f16 -> 16, 8-bit -> 32."""
    itemsize = jnp.dtype(dtype).itemsize
    return 8 * max(1, 4 // itemsize)


def _num_tensorcores() -> int:
    """Best-effort TensorCores-per-device; used only to gate the 2-chunk split."""
    try:
        kind = jax.devices()[0].device_kind.lower().replace(" ", "").replace("-", "")
    except Exception:
        return 1
    # Single-TC parts first (v5e / v6e / other "lite" chips).
    if "lite" in kind or "v5e" in kind or "v6e" in kind:
        return 1
    # v7x exposes 2 TCs per chip; v4 / v5p megacore also shard "parallel" axes.
    if "v7" in kind or "v4" in kind or "v5p" in kind or "v5" in kind:
        return 2
    return 1


def _rmse_partial_kernel(yhat_ref, y_ref, out_ref, acc_ref, *,
                         valid_rows, block_rows, blocks_per_chunk,
                         full_blocks, apply_mask, sub_rows, n_sub):
    c = pl.program_id(0)          # "parallel" chunk axis (both TCs on v7x)
    j = pl.program_id(1)          # "arbitrary" reduction axis within the chunk

    @pl.when(j == 0)
    def _init():
        acc_ref[...] = jnp.zeros_like(acc_ref)

    def partial_sum(r0, mask_base):
        d = (yhat_ref[pl.ds(r0, sub_rows), :].astype(jnp.float32)
             - y_ref[pl.ds(r0, sub_rows), :].astype(jnp.float32))
        sq = d * d
        if mask_base is not None:
            # Zero rows past the logical end of the data.  jnp.where is a
            # select, so unspecified boundary data (even NaN) cannot leak.
            row_ids = mask_base + r0 + lax.broadcasted_iota(jnp.int32, sq.shape, 0)
            sq = jnp.where(row_ids < valid_rows, sq, 0.0)
        # Fold to an (8, 128) partial with pure VPU adds (no cross-lane reduce).
        return jnp.sum(sq.reshape(sub_rows // 8, 8, _COLS), axis=0)

    def accumulate(mask_base=None):
        if n_sub == 1:
            acc_ref[...] += partial_sum(0, mask_base)
        else:
            # Sub-slice loop bounds live ranges so the squared-diff temporaries
            # never materialize as block-sized VMEM stores competing with the
            # streaming DMAs.
            def body(s, carry):
                r0 = pl.multiple_of(s * sub_rows, sub_rows)
                acc_ref[...] += partial_sum(r0, mask_base)
                return carry
            lax.fori_loop(0, n_sub, body, 0, unroll=2)

    if apply_mask:
        blk = c * blocks_per_chunk + j
        # Interior blocks: unmasked fast path (stays HBM-bound).
        @pl.when(blk < full_blocks)
        def _fast():
            accumulate()

        # Boundary block (and any clamped duplicate block): masked path.
        @pl.when(blk >= full_blocks)
        def _masked():
            accumulate(mask_base=blk * block_rows)
    else:
        accumulate()

    @pl.when(j == pl.num_programs(1) - 1)
    def _finalize():
        out_ref[...] = acc_ref[...]


def rmse_loss(yhat, y, eps: float = 1e-6, *, max_block_rows: int | None = None):
    """sqrt(mean((yhat - y)^2) + eps), matching torch MSELoss 'mean' reduction."""
    assert yhat.shape == y.shape, "yhat and y must have the same shape"
    n = yhat.size
    eps32 = jnp.float32(eps)

    if n == 0:
        return jnp.sqrt(jnp.float32(jnp.nan) + eps32)

    yf = yhat.reshape(-1)
    xf = y.reshape(-1)

    sub = max(_sublane_multiple(yf.dtype), _sublane_multiple(xf.dtype))
    pad_unit = _COLS * sub
    prefix = (n // pad_unit) * pad_unit

    # Tiny ragged tail (< 128*sublane elements) folded in plain JAX — avoids a
    # jnp.pad fallback that would re-read+re-write both inputs through HBM.
    if prefix != n:
        dt = yf[prefix:].astype(jnp.float32) - xf[prefix:].astype(jnp.float32)
        tail_sq = jnp.sum(dt * dt)
    else:
        tail_sq = jnp.float32(0.0)

    if prefix == 0:
        # Whole input smaller than one aligned slab — pure-JAX path.
        return jnp.sqrt(tail_sq / jnp.float32(n) + eps32)

    rows = prefix // _COLS                       # multiple of `sub` (>= 8)
    y2d = yf[:prefix].reshape(rows, _COLS)
    x2d = xf[:prefix].reshape(rows, _COLS)

    # Dtype-aware block size: ~4 MiB HBM bytes per input per buffer.
    max_item = max(jnp.dtype(y2d.dtype).itemsize, jnp.dtype(x2d.dtype).itemsize)
    target_rows = _TARGET_BLOCK_BYTES // (_COLS * max_item)   # 8192 f32 / 16384 bf16
    if max_block_rows is not None:
        target_rows = max(sub, (min(target_rows, int(max_block_rows)) // sub) * sub)
    block_rows = min(target_rows, rows)          # multiple of `sub` by construction

    total_blocks = pl.cdiv(rows, block_rows)
    n_chunks = 2 if (_num_tensorcores() >= 2 and total_blocks >= 2) else 1
    blocks_per_chunk = pl.cdiv(total_blocks, n_chunks)
    full_blocks = rows // block_rows             # blocks with no masking needed
    apply_mask = (n_chunks * blocks_per_chunk * block_rows) != rows

    sub_rows = next(s for s in _SUB_ROWS_CANDIDATES if block_rows % s == 0)
    n_sub = block_rows // sub_rows

    def in_index(c, j):
        # Clamp so a DMA never starts past the array; any duplicated block is
        # masked to zero inside the kernel.
        return (jnp.minimum(c * blocks_per_chunk + j, total_blocks - 1), 0)

    kernel = functools.partial(
        _rmse_partial_kernel,
        valid_rows=rows,
        block_rows=block_rows,
        blocks_per_chunk=blocks_per_chunk,
        full_blocks=full_blocks,
        apply_mask=apply_mask,
        sub_rows=sub_rows,
        n_sub=n_sub,
    )

    itemsizes = jnp.dtype(y2d.dtype).itemsize + jnp.dtype(x2d.dtype).itemsize
    block_in_bytes = block_rows * _COLS * itemsizes          # both inputs, one buffer
    # Double-buffered inputs + generous margin; explicit so v5e's 16 MiB scoped
    # default doesn't block the big-block win; stays well under v7x's 64 MiB.
    vmem_limit_bytes = int(min(2 * block_in_bytes + (4 << 20), 48 << 20))

    cost = pl.CostEstimate(
        flops=3 * prefix,
        transcendentals=0,
        bytes_accessed=prefix * itemsizes + n_chunks * 8 * _COLS * 4,
    )

    partials = pl.pallas_call(
        kernel,
        out_shape=jax.ShapeDtypeStruct((n_chunks * 8, _COLS), jnp.float32),
        grid_spec=pltpu.PrefetchScalarGridSpec(
            num_scalar_prefetch=0,
            grid=(n_chunks, blocks_per_chunk),
            in_specs=[
                pl.BlockSpec((block_rows, _COLS), in_index),
                pl.BlockSpec((block_rows, _COLS), in_index),
            ],
            out_specs=pl.BlockSpec((8, _COLS), lambda c, j: (c, 0)),
            scratch_shapes=[pltpu.VMEM((8, _COLS), jnp.float32)],
        ),
        compiler_params=pltpu.CompilerParams(
            dimension_semantics=("parallel", "arbitrary"),
            vmem_limit_bytes=vmem_limit_bytes,
        ),
        cost_estimate=cost,
    )(y2d, x2d)

    # Tiny epilogue: combine per-chunk (8,128) partials + tail, mean, +eps, sqrt.
    # TODO(synk): for n >~ 1e8 a widened / pairwise partial accumulator would
    # track a float64 reference more tightly; f32 matches torch in practice.
    total = jnp.sum(partials) + tail_sq
    return jnp.sqrt(total / jnp.float32(n) + eps32)


if __name__ == "__main__":
    key = jax.random.PRNGKey(0)
    k1, k2, k3, k4, k5, k6 = jax.random.split(key, 6)
    eps = 1e-6

    # 1) Small NCHW f32 example (the module's typical usage).
    shape = (2, 4, 16, 16)
    yhat = jax.random.normal(k1, shape, dtype=jnp.float32)
    y = jax.random.normal(k2, shape, dtype=jnp.float32)
    loss = jax.block_until_ready(rmse_loss(yhat, y, eps=eps))
    ref = jnp.sqrt(jnp.mean((yhat - y) ** 2) + eps)
    assert jnp.allclose(loss, ref, rtol=1e-5, atol=1e-6), (loss, ref)

    # 2) bf16 streaming case: exercises native-dtype streaming and the
    #    in-block sub-slice fori_loop fold (n_sub > 1).
    shape2 = (2, 4, 64, 640)
    yhat2 = jax.random.normal(k3, shape2, dtype=jnp.float32).astype(jnp.bfloat16)
    y2 = jax.random.normal(k4, shape2, dtype=jnp.float32).astype(jnp.bfloat16)
    loss2 = jax.block_until_ready(rmse_loss(yhat2, y2, eps=eps))
    d2 = yhat2.astype(jnp.float32) - y2.astype(jnp.float32)
    ref2 = jnp.sqrt(jnp.mean(d2 * d2) + eps)
    assert jnp.allclose(loss2, ref2, rtol=1e-4, atol=1e-6), (loss2, ref2)

    # 3) Ragged f32 case with an artificially small block: exercises the
    #    multi-block grid, the boundary-block-only mask, the clamped index_map
    #    and the pure-JAX tail path (no jnp.pad).
    shape3 = (3, 5, 37, 33)
    yhat3 = jax.random.normal(k5, shape3, dtype=jnp.float32)
    y3 = jax.random.normal(k6, shape3, dtype=jnp.float32)
    loss3 = jax.block_until_ready(rmse_loss(yhat3, y3, eps=eps, max_block_rows=64))
    ref3 = jnp.sqrt(jnp.mean((yhat3 - y3) ** 2) + eps)
    assert jnp.allclose(loss3, ref3, rtol=1e-5, atol=1e-6), (loss3, ref3)

    print("KERNEL_OK")
</pallas_src>

<mosaic_0001>
module attributes {stable_mosaic.version = 11 : i64} {
  func.func @_rmse_partial_kernel(%arg0: i32, %arg1: i32, %arg2: memref<16x128xf32, #tpu.memory_space<vmem>>, %arg3: memref<16x128xf32, #tpu.memory_space<vmem>>, %arg4: memref<8x128xf32, #tpu.memory_space<vmem>>, %arg5: memref<8x128xf32, #tpu.memory_space<vmem>>) attributes {dimension_semantics = [#tpu.dimension_semantics<parallel>, #tpu.dimension_semantics<arbitrary>], iteration_bounds = array<i64: 1, 1>, scalar_prefetch = 0 : i64, scratch_operands = 1 : i64, tpu.core_type = #tpu.core_type<tc>, window_params = [{transform_indices = @transform_0, window_bounds = array<i64: 16, 128>}, {transform_indices = @transform_1, window_bounds = array<i64: 16, 128>}, {transform_indices = @transform_2, window_bounds = array<i64: 8, 128>}]} {
    %c0_i32 = arith.constant 0 : i32
    %0 = arith.cmpi eq, %arg1, %c0_i32 : i32
    %1 = arith.extui %0 : i1 to i32
    %c0_i32_0 = arith.constant 0 : i32
    %2 = arith.cmpi ne, %1, %c0_i32_0 : i32
    scf.if %2 {
      %cst_10 = arith.constant 0.000000e+00 : f32
      %15 = vector.broadcast %cst_10 : f32 to vector<8x128xf32>
      %c0_11 = arith.constant 0 : index
      %c0_12 = arith.constant 0 : index
      %16 = vector.load %arg5[%c0_11, %c0_12] : memref<8x128xf32, #tpu.memory_space<vmem>>, vector<8x128xf32>
      tpu.vector_store %arg5[%c0_11, %c0_12], %15 {strides = array<i32>} : memref<8x128xf32, #tpu.memory_space<vmem>>, vector<8x128xf32>,
    } else {
    }
    %c0 = arith.constant 0 : index
    %c0_1 = arith.constant 0 : index
    %3 = vector.load %arg5[%c0, %c0_1] : memref<8x128xf32, #tpu.memory_space<vmem>>, vector<8x128xf32>
    %c0_2 = arith.constant 0 : index
    %c0_3 = arith.constant 0 : index
    %4 = vector.load %arg2[%c0_2, %c0_3] : memref<16x128xf32, #tpu.memory_space<vmem>>, vector<16x128xf32>
    %c0_4 = arith.constant 0 : index
    %c0_5 = arith.constant 0 : index
    %5 = vector.load %arg3[%c0_4, %c0_5] : memref<16x128xf32, #tpu.memory_space<vmem>>, vector<16x128xf32>
    %6 = arith.subf %4, %5 : vector<16x128xf32>
    %7 = arith.mulf %6, %6 : vector<16x128xf32>
    %8 = vector.shape_cast %7 : vector<16x128xf32> to vector<2x8x128xf32>
    %cst = arith.constant dense<0.000000e+00> : vector<8x128xf32>
    %9 = vector.multi_reduction <add>, %8, %cst [0] : vector<2x8x128xf32> to vector<8x128xf32>
    %10 = arith.addf %3, %9 : vector<8x128xf32>
    %c0_6 = arith.constant 0 : index
    %c0_7 = arith.constant 0 : index
    %11 = vector.load %arg5[%c0_6, %c0_7] : memref<8x128xf32, #tpu.memory_space<vmem>>, vector<8x128xf32>
    tpu.vector_store %arg5[%c0_6, %c0_7], %10 {strides = array<i32>} : memref<8x128xf32, #tpu.memory_space<vmem>>, vector<8x128xf32>,
    %c0_i32_8 = arith.constant 0 : i32
    %12 = arith.cmpi eq, %arg1, %c0_i32_8 : i32
    %13 = arith.extui %12 : i1 to i32
    %c0_i32_9 = arith.constant 0 : i32
    %14 = arith.cmpi ne, %13, %c0_i32_9 : i32
    scf.if %14 {
      %c0_10 = arith.constant 0 : index
      %c0_11 = arith.constant 0 : index
      %15 = vector.load %arg5[%c0_10, %c0_11] : memref<8x128xf32, #tpu.memory_space<vmem>>, vector<8x128xf32>
      %c0_12 = arith.constant 0 : index
      %c0_13 = arith.constant 0 : index
      %16 = vector.load %arg4[%c0_12, %c0_13] : memref<8x128xf32, #tpu.memory_space<vmem>>, vector<8x128xf32>
      tpu.vector_store %arg4[%c0_12, %c0_13], %15 {strides = array<i32>} : memref<8x128xf32, #tpu.memory_space<vmem>>, vector<8x128xf32>,
    } else {
    }
    return
  }
  func.func @transform_0(%arg0: i32, %arg1: i32) -> (i32, i32) {
    %c1_i32 = arith.constant 1 : i32
    %0 = arith.muli %arg0, %c1_i32 : i32
    %1 = arith.addi %0, %arg1 : i32
    %c0_i32 = arith.constant 0 : i32
    %2 = arith.minsi %1, %c0_i32 : i32
    %c0_i32_0 = arith.constant 0 : i32
    %c0_i32_1 = arith.constant 0 : i32
    return %2, %c0_i32_0 : i32, i32
  }
  func.func @transform_1(%arg0: i32, %arg1: i32) -> (i32, i32) {
    %c1_i32 = arith.constant 1 : i32
    %0 = arith.muli %arg0, %c1_i32 : i32
    %1 = arith.addi %0, %arg1 : i32
    %c0_i32 = arith.constant 0 : i32
    %2 = arith.minsi %1, %c0_i32 : i32
    %c0_i32_0 = arith.constant 0 : i32
    %c0_i32_1 = arith.constant 0 : i32
    return %2, %c0_i32_0 : i32, i32
  }
  func.func @transform_2(%arg0: i32, %arg1: i32) -> (i32, i32) {
    %c0_i32 = arith.constant 0 : i32
    %c0_i32_0 = arith.constant 0 : i32
    return %arg0, %c0_i32 : i32, i32
  }
}

</mosaic_0001>

<bundles_post_ra>
// kernel: tpu_custom_call.1
= control target key start
LH: loop header
LB: loop body
LE: loop exit
PB: predicated region body
PF: predicated region fallthrough
CT: control target
= control target key end

     0   :  { %7 = vsyncpa [#allocation4], 0  ;;  %s220_s0 = inlined_call_operand.hbm [shape: f32[16,128], index: 0, kind: input, shape index: {}]   ;;  %s221_s1 = inlined_call_operand.hbm [shape: f32[16,128], index: 1, kind: input, shape index: {}]   ;;  %s222_s2 = inlined_call_operand.hbm [shape: f32[8,128], index: 2, kind: output, shape index: {}]  }
   0x1   :  { %8 = vsyncpa [#allocation7], 0 }
   0x2   :  { %9 = vsyncpa [#allocation5], 0  ;;  %s20_s11 = sshll.u32 %s220_s0, 4  ;;  %s191_s12 = smov [#allocation3]   ;;  %s21_s11 = int_to_ptr.hbm [resolvable:$true] %s20_s11 }
   0x3   :  { %s22_s13 = sshll.u32 %s191_s12, 4  ;;  %s39_s16 = sshll.u32 %s221_s1, 4  ;;  %s23_s13 = int_to_ptr.vmem [resolvable:$true] %s22_s13  ;;  %s40_s16 = int_to_ptr.hbm [resolvable:$true] %s39_s16 }
   0x4   :  { %s192_s17 = smov 128   ;;  %s193_s18 = smov 8  }
   0x5   :  { %28 = dma.hbm_to_vmem [thread:$0]  %s21_s11, 256, %s23_s13, [#allocation4], %s192_s17, %s192_s17, %s193_s18  }
   0x6   :  { %s194_s19 = smov [#allocation6]  }
   0x7   :  { %s41_s20 = sshll.u32 %s194_s19, 4  ;;  %s42_s20 = int_to_ptr.vmem [resolvable:$true] %s41_s20 }
   0x8   :  { %47 = dma.hbm_to_vmem [thread:$0]  %s40_s16, 256, %s42_s20, [#allocation7], %s192_s17, %s192_s17, %s193_s18  }
   0x9   :  { %185 = dma.done.wait [#allocation4], 256  }
   0xa   :  { %186 = vsyncadd [#allocation4], 4294967040 }
   0xb   :  { %187 = dma.done.wait [#allocation7], 256  }
   0xc   :  { %188 = vsyncadd [#allocation7], 4294967040  ;;  %v70_v0 = vld [vmem:[#allocation3] sm:$0xff]  ;;  %v71_v1 = vld [vmem:[#allocation3 + $0x8] sm:$0xff]  ;;  %s195_s0 = smov [#allocation8]   ;;  %s93_s23 = sshll.u32 %s222_s2, 4  ;;  %s94_s23 = int_to_ptr.hbm [resolvable:$true] %s93_s23 }
   0xd   :  { %v72_v2 = vld [vmem:[#allocation6] sm:$0xff]  ;;  %v73_v3 = vld [vmem:[#allocation6 + $0x8] sm:$0xff]  ;;  %s91_s1 = sshll.u32 %s195_s0, 4  ;;  %s92_s1 = int_to_ptr.vmem [resolvable:$true] %s91_s1 }
   0xe   :  { %v74_v4 = vsub.f32 %v70_v0, %v72_v2  ;;  %v75_v5 = vsub.f32 %v71_v1, %v73_v3 }
  0x10   :  { %v76_v6 = vmul.f32 %v74_v4, %v74_v4  ;;  %v77_v7 = vmul.f32 %v75_v5, %v75_v5 }
  0x12   :  { %v78_v8 = vadd.f32 %v77_v7, %v76_v6 }
  0x14   :  { %85 = vst [vmem:[#allocation8] sm:$0xff] %v78_v8 }
  0x15   :  { %96 = dma.vmem_to_hbm [thread:$0]  %s92_s1, 128, %s94_s23, [#allocation5]  }
  0x16   :  { %189 = dma.done.wait [#allocation5], 128  }
  0x17   :  { %190 = vsyncadd [#allocation5], 4294967168 }
  0x18   :  { %101 = vsyncpa [#allocation4], 1 }
  0x19   :  { %102 = vsyncpa [#allocation7], 1 }
  0x1a   :  { %103 = vsyncpa [#allocation5], 1 }

</bundles_post_ra>
